<compile_context>
chip_gen: v7x
topology: tpu7x:2x2x1
jax: 0.10.0
libtpu: 0.0.40
codegen_flags: <defaults>
</compile_context>

<pallas_src>
import functools

import jax
import jax.numpy as jnp
from jax import lax
from jax.experimental import pallas as pl
from jax.experimental.pallas import tpu as pltpu

EPS = 1e-5


def _round_up(x, m):
    return ((x + m - 1) // m) * m


def _pick_tile(dim_pad, max_tile):
    """Largest multiple of 128 that divides dim_pad and is <= max_tile."""
    m = dim_pad // 128
    limit = max(1, max_tile // 128)
    best = 1
    for d in range(1, min(m, limit) + 1):
        if m % d == 0:
            best = d
    return 128 * best


def _bn_stats_kernel(x_ref, gamma_ref, beta_ref, scale_ref, shift_ref, *, inv_b):
    """Grid (feature tiles [parallel], batch tiles [reduction]).

    Accumulates sum(x) / sum(x*x) in the resident output blocks, then folds
    gamma/beta into per-feature scale/shift at the last batch tile.
    Zero-padded batch rows contribute 0 to both sums; inv_b uses the true B.
    """
    b = pl.program_id(1)

    @pl.when(b == 0)
    def _():
        scale_ref[...] = jnp.zeros_like(scale_ref)
        shift_ref[...] = jnp.zeros_like(shift_ref)

    x = x_ref[...].astype(jnp.float32)
    scale_ref[...] += jnp.sum(x, axis=0, keepdims=True)
    shift_ref[...] += jnp.sum(x * x, axis=0, keepdims=True)

    @pl.when(b == pl.num_programs(1) - 1)
    def _():
        mean = scale_ref[...] * inv_b
        ex2 = shift_ref[...] * inv_b
        var = jnp.maximum(ex2 - mean * mean, 0.0)        # guard cancellation
        sc = gamma_ref[...] * lax.rsqrt(var + EPS)       # rsqrt -> EUP slot
        scale_ref[...] = sc
        shift_ref[...] = beta_ref[...] - mean * sc


def _reglog_matmul_kernel(x_ref, scale_ref, shift_ref, w_ref, b_ref, o_ref):
    """Grid (batch tiles, label tiles, feature tiles [reduction]).

    x_ref     : (tb, tk) raw features
    scale_ref : (1, tk)  folded BN scale
    shift_ref : (1, tk)  folded BN shift
    w_ref     : (tk, tn) bf16 weight, already (features, labels) layout
    b_ref     : (1, tn)  f32 bias
    o_ref     : (tb, tn) f32 output block, resident across the k axis
    """
    k = pl.program_id(2)

    @pl.when(k == 0)
    def _():
        o_ref[...] = jnp.zeros_like(o_ref)

    x = x_ref[...].astype(jnp.float32)
    x_bn = (x * scale_ref[...] + shift_ref[...]).astype(jnp.bfloat16)
    o_ref[...] += jnp.dot(x_bn, w_ref[...], preferred_element_type=jnp.float32)

    @pl.when(k == pl.num_programs(2) - 1)
    def _():
        o_ref[...] += b_ref[...]


def prepare_reglog_params(weight, bias, gamma, beta, *, block_n=512, block_k=2048):
    """One-time (per head) parameter prep, hoisted out of the per-batch path:
    pad to lane multiples, transpose the weight to (F_pad, L_pad), cast to bf16.
    """
    L, F = weight.shape
    F_pad = _round_up(F, 128)
    L_pad = _round_up(L, 128)
    tk = _pick_tile(F_pad, block_k)
    tn = _pick_tile(L_pad, block_n)

    if F_pad != F or L_pad != L:
        weight = jnp.pad(weight, ((0, L_pad - L), (0, F_pad - F)))
    wt = weight.astype(jnp.bfloat16).T                                  # (F_pad, L_pad)
    bias2 = jnp.pad(bias.astype(jnp.float32), (0, L_pad - L)).reshape(1, L_pad)
    gamma2 = jnp.pad(gamma.astype(jnp.float32), (0, F_pad - F)).reshape(1, F_pad)
    beta2 = jnp.pad(beta.astype(jnp.float32), (0, F_pad - F)).reshape(1, F_pad)

    return dict(wt=wt, bias=bias2, gamma=gamma2, beta=beta2,
                F=F, L=L, F_pad=F_pad, L_pad=L_pad, tk=tk, tn=tn)


def reglog_forward_prepared(x, params, *, block_b=256):
    """Per-batch path: x -> BN(x) @ W.T + b using pre-prepped parameters."""
    if x.ndim > 2:
        # TODO(synk): BatchNorm1d per-channel semantics for 3-D inputs are not
        # reproduced; flatten-then-normalize matches the 2-D (B, F) case.
        x = x.reshape(x.shape[0], -1)
    B, F = x.shape
    assert F == params["F"], "feature dim mismatch"
    F_pad, L_pad = params["F_pad"], params["L_pad"]
    tk, tn, L = params["tk"], params["tn"], params["L"]

    # Batch tiling: minimal zero padding, tb a multiple of 8.
    nb = -(-B // max(block_b, 8))
    tb = _round_up(-(-B // nb), 8)
    B_pad = nb * tb

    if B_pad != B or F_pad != F:
        x = jnp.pad(x, ((0, B_pad - B), (0, F_pad - F)))

    nf = F_pad // tk
    nj = L_pad // tn
    x_b = x.dtype.itemsize

    # ---- stage 1: per-feature BN scale / shift (one pass over x) ----------
    stats_vmem = 2 * (tb * tk * x_b + 4 * tk * 4) + 3 * tb * tk * 4
    scale, shift = pl.pallas_call(
        functools.partial(_bn_stats_kernel, inv_b=1.0 / B),
        out_shape=(jax.ShapeDtypeStruct((1, F_pad), jnp.float32),
                   jax.ShapeDtypeStruct((1, F_pad), jnp.float32)),
        grid_spec=pltpu.PrefetchScalarGridSpec(
            num_scalar_prefetch=0,
            grid=(nf, nb),                                     # features, batch(red.)
            in_specs=[
                pl.BlockSpec((tb, tk), lambda f, b: (b, f)),   # x
                pl.BlockSpec((1, tk), lambda f, b: (0, f)),    # gamma
                pl.BlockSpec((1, tk), lambda f, b: (0, f)),    # beta
            ],
            out_specs=[
                pl.BlockSpec((1, tk), lambda f, b: (0, f)),    # scale
                pl.BlockSpec((1, tk), lambda f, b: (0, f)),    # shift
            ],
        ),
        compiler_params=pltpu.CompilerParams(
            dimension_semantics=("parallel", "arbitrary"),
            vmem_limit_bytes=max(int(stats_vmem * 1.5) + (4 << 20), 32 << 20),
        ),
    )(x, params["gamma"], params["beta"])

    # ---- stage 2: (x*scale + shift) @ W.T + b ------------------------------
    main_vmem = (2 * (tb * tk * x_b + 2 * tk * 4 + tk * tn * 2 + tn * 4
                      + tb * tn * 4)
                 + 3 * tb * tk * 4)
    out = pl.pallas_call(
        _reglog_matmul_kernel,
        out_shape=jax.ShapeDtypeStruct((B_pad, L_pad), jnp.float32),
        grid_spec=pltpu.PrefetchScalarGridSpec(
            num_scalar_prefetch=0,
            grid=(nb, nj, nf),                                    # batch, labels, features(red.)
            in_specs=[
                pl.BlockSpec((tb, tk), lambda b, j, k: (b, k)),   # x
                pl.BlockSpec((1, tk), lambda b, j, k: (0, k)),    # scale
                pl.BlockSpec((1, tk), lambda b, j, k: (0, k)),    # shift
                pl.BlockSpec((tk, tn), lambda b, j, k: (k, j)),   # W^T (bf16)
                pl.BlockSpec((1, tn), lambda b, j, k: (0, j)),    # bias
            ],
            out_specs=pl.BlockSpec((tb, tn), lambda b, j, k: (b, j)),
        ),
        compiler_params=pltpu.CompilerParams(
            dimension_semantics=("parallel", "parallel", "arbitrary"),
            vmem_limit_bytes=max(int(main_vmem * 1.5) + (4 << 20), 32 << 20),
        ),
    )(x, scale, shift, params["wt"], params["bias"])

    return out[:B, :L]


def reglog_forward(x, gamma, beta, weight, bias, *,
                   block_b=256, block_n=512, block_k=2048):
    """Convenience wrapper (in a real eval loop, prepare once and reuse)."""
    params = prepare_reglog_params(weight, bias, gamma, beta,
                                   block_n=block_n, block_k=block_k)
    return reglog_forward_prepared(x, params, block_b=block_b)


def _reference(x, gamma, beta, weight, bias):
    x = x.astype(jnp.float32)
    mean = jnp.mean(x, axis=0, keepdims=True)
    var = jnp.mean((x - mean) ** 2, axis=0, keepdims=True)
    x_bn = (x - mean) / jnp.sqrt(var + EPS) * gamma + beta
    return x_bn @ weight.T + bias


if __name__ == "__main__":
    B, FEAT, LABELS = 8, 32, 16

    key = jax.random.PRNGKey(0)
    kx, kw = jax.random.split(key)

    x = jax.random.normal(kx, (B, FEAT), dtype=jnp.float32)

    # Parameters mirroring RegLog.__init__ defaults:
    #   BatchNorm1d: gamma=1, beta=0
    #   Linear: weight ~ N(0, 0.01) (reinit_head=True), bias = 0
    gamma = jnp.ones((FEAT,), dtype=jnp.float32)
    beta = jnp.zeros((FEAT,), dtype=jnp.float32)
    weight = 0.01 * jax.random.normal(kw, (LABELS, FEAT), dtype=jnp.float32)
    bias = jnp.zeros((LABELS,), dtype=jnp.float32)

    params = prepare_reglog_params(weight, bias, gamma, beta)
    out = reglog_forward_prepared(x, params)
    out = jax.block_until_ready(out)

    ref = _reference(x, gamma, beta, weight, bias)
    assert out.shape == (B, LABELS)
    # bf16 MXU operands -> slightly looser tolerance than pure f32.
    assert jnp.allclose(out, ref, atol=5e-3, rtol=5e-3), "mismatch vs reference"

    print("KERNEL_OK")
</pallas_src>

<mosaic_0001>
module attributes {stable_mosaic.version = 11 : i64} {
  func.func @_bn_stats_kernel(%arg0: i32, %arg1: i32, %arg2: memref<8x128xf32, #tpu.memory_space<vmem>>, %arg3: memref<1x128xf32, #tpu.memory_space<vmem>>, %arg4: memref<1x128xf32, #tpu.memory_space<vmem>>, %arg5: memref<1x128xf32, #tpu.memory_space<vmem>>, %arg6: memref<1x128xf32, #tpu.memory_space<vmem>>) attributes {dimension_semantics = [#tpu.dimension_semantics<parallel>, #tpu.dimension_semantics<arbitrary>], iteration_bounds = array<i64: 1, 1>, scalar_prefetch = 0 : i64, scratch_operands = 0 : i64, tpu.core_type = #tpu.core_type<tc>, window_params = [{transform_indices = @transform_0, window_bounds = array<i64: 8, 128>}, {transform_indices = @transform_1, window_bounds = array<i64: 1, 128>}, {transform_indices = @transform_2, window_bounds = array<i64: 1, 128>}, {transform_indices = @transform_3, window_bounds = array<i64: 1, 128>}, {transform_indices = @transform_4, window_bounds = array<i64: 1, 128>}]} {
    %c0_i32 = arith.constant 0 : i32
    %0 = arith.cmpi eq, %arg1, %c0_i32 : i32
    %1 = arith.extui %0 : i1 to i32
    %c0_i32_0 = arith.constant 0 : i32
    %2 = arith.cmpi ne, %1, %c0_i32_0 : i32
    scf.if %2 {
      %cst_13 = arith.constant 0.000000e+00 : f32
      %18 = vector.broadcast %cst_13 : f32 to vector<1x128xf32>
      %c0_14 = arith.constant 0 : index
      %c0_15 = arith.constant 0 : index
      %19 = vector.load %arg5[%c0_14, %c0_15] : memref<1x128xf32, #tpu.memory_space<vmem>>, vector<1x128xf32>
      tpu.vector_store %arg5[%c0_14, %c0_15], %18 {strides = array<i32>} : memref<1x128xf32, #tpu.memory_space<vmem>>, vector<1x128xf32>,
      %cst_16 = arith.constant 0.000000e+00 : f32
      %20 = vector.broadcast %cst_16 : f32 to vector<1x128xf32>
      %c0_17 = arith.constant 0 : index
      %c0_18 = arith.constant 0 : index
      %21 = vector.load %arg6[%c0_17, %c0_18] : memref<1x128xf32, #tpu.memory_space<vmem>>, vector<1x128xf32>
      tpu.vector_store %arg6[%c0_17, %c0_18], %20 {strides = array<i32>} : memref<1x128xf32, #tpu.memory_space<vmem>>, vector<1x128xf32>,
    } else {
    }
    %c0 = arith.constant 0 : index
    %c0_1 = arith.constant 0 : index
    %3 = vector.load %arg2[%c0, %c0_1] : memref<8x128xf32, #tpu.memory_space<vmem>>, vector<8x128xf32>
    %c0_2 = arith.constant 0 : index
    %c0_3 = arith.constant 0 : index
    %4 = vector.load %arg5[%c0_2, %c0_3] : memref<1x128xf32, #tpu.memory_space<vmem>>, vector<1x128xf32>
    %cst = arith.constant dense<0.000000e+00> : vector<128xf32>
    %5 = vector.multi_reduction <add>, %3, %cst [0] : vector<8x128xf32> to vector<128xf32>
    %6 = vector.shape_cast %5 : vector<128xf32> to vector<1x128xf32>
    %7 = arith.addf %4, %6 : vector<1x128xf32>
    %c0_4 = arith.constant 0 : index
    %c0_5 = arith.constant 0 : index
    %8 = vector.load %arg5[%c0_4, %c0_5] : memref<1x128xf32, #tpu.memory_space<vmem>>, vector<1x128xf32>
    tpu.vector_store %arg5[%c0_4, %c0_5], %7 {strides = array<i32>} : memref<1x128xf32, #tpu.memory_space<vmem>>, vector<1x128xf32>,
    %c0_6 = arith.constant 0 : index
    %c0_7 = arith.constant 0 : index
    %9 = vector.load %arg6[%c0_6, %c0_7] : memref<1x128xf32, #tpu.memory_space<vmem>>, vector<1x128xf32>
    %10 = arith.mulf %3, %3 : vector<8x128xf32>
    %cst_8 = arith.constant dense<0.000000e+00> : vector<128xf32>
    %11 = vector.multi_reduction <add>, %10, %cst_8 [0] : vector<8x128xf32> to vector<128xf32>
    %12 = vector.shape_cast %11 : vector<128xf32> to vector<1x128xf32>
    %13 = arith.addf %9, %12 : vector<1x128xf32>
    %c0_9 = arith.constant 0 : index
    %c0_10 = arith.constant 0 : index
    %14 = vector.load %arg6[%c0_9, %c0_10] : memref<1x128xf32, #tpu.memory_space<vmem>>, vector<1x128xf32>
    tpu.vector_store %arg6[%c0_9, %c0_10], %13 {strides = array<i32>} : memref<1x128xf32, #tpu.memory_space<vmem>>, vector<1x128xf32>,
    %c0_i32_11 = arith.constant 0 : i32
    %15 = arith.cmpi eq, %arg1, %c0_i32_11 : i32
    %16 = arith.extui %15 : i1 to i32
    %c0_i32_12 = arith.constant 0 : i32
    %17 = arith.cmpi ne, %16, %c0_i32_12 : i32
    scf.if %17 {
      %c0_13 = arith.constant 0 : index
      %c0_14 = arith.constant 0 : index
      %18 = vector.load %arg5[%c0_13, %c0_14] : memref<1x128xf32, #tpu.memory_space<vmem>>, vector<1x128xf32>
      %cst_15 = arith.constant 1.250000e-01 : f32
      %19 = vector.broadcast %cst_15 : f32 to vector<1x128xf32>
      %20 = arith.mulf %18, %19 : vector<1x128xf32>
      %c0_16 = arith.constant 0 : index
      %c0_17 = arith.constant 0 : index
      %21 = vector.load %arg6[%c0_16, %c0_17] : memref<1x128xf32, #tpu.memory_space<vmem>>, vector<1x128xf32>
      %cst_18 = arith.constant 1.250000e-01 : f32
      %22 = vector.broadcast %cst_18 : f32 to vector<1x128xf32>
      %23 = arith.mulf %21, %22 : vector<1x128xf32>
      %24 = arith.mulf %20, %20 : vector<1x128xf32>
      %25 = arith.subf %23, %24 : vector<1x128xf32>
      %cst_19 = arith.constant 0.000000e+00 : f32
      %26 = vector.broadcast %cst_19 : f32 to vector<1x128xf32>
      %27 = arith.maximumf %25, %26 : vector<1x128xf32>
      %c0_20 = arith.constant 0 : index
      %c0_21 = arith.constant 0 : index
      %28 = vector.load %arg3[%c0_20, %c0_21] : memref<1x128xf32, #tpu.memory_space<vmem>>, vector<1x128xf32>
      %cst_22 = arith.constant 9.99999974E-6 : f32
      %29 = vector.broadcast %cst_22 : f32 to vector<1x128xf32>
      %30 = arith.addf %27, %29 : vector<1x128xf32>
      %31 = math.rsqrt %30 : vector<1x128xf32>
      %32 = arith.mulf %28, %31 : vector<1x128xf32>
      %c0_23 = arith.constant 0 : index
      %c0_24 = arith.constant 0 : index
      %33 = vector.load %arg5[%c0_23, %c0_24] : memref<1x128xf32, #tpu.memory_space<vmem>>, vector<1x128xf32>
      tpu.vector_store %arg5[%c0_23, %c0_24], %32 {strides = array<i32>} : memref<1x128xf32, #tpu.memory_space<vmem>>, vector<1x128xf32>,
      %c0_25 = arith.constant 0 : index
      %c0_26 = arith.constant 0 : index
      %34 = vector.load %arg4[%c0_25, %c0_26] : memref<1x128xf32, #tpu.memory_space<vmem>>, vector<1x128xf32>
      %35 = arith.mulf %20, %32 : vector<1x128xf32>
      %36 = arith.subf %34, %35 : vector<1x128xf32>
      %c0_27 = arith.constant 0 : index
      %c0_28 = arith.constant 0 : index
      %37 = vector.load %arg6[%c0_27, %c0_28] : memref<1x128xf32, #tpu.memory_space<vmem>>, vector<1x128xf32>
      tpu.vector_store %arg6[%c0_27, %c0_28], %36 {strides = array<i32>} : memref<1x128xf32, #tpu.memory_space<vmem>>, vector<1x128xf32>,
    } else {
    }
    return
  }
  func.func @transform_0(%arg0: i32, %arg1: i32) -> (i32, i32) {
    %c0_i32 = arith.constant 0 : i32
    return %arg1, %arg0 : i32, i32
  }
  func.func @transform_1(%arg0: i32, %arg1: i32) -> (i32, i32) {
    %c0_i32 = arith.constant 0 : i32
    %c0_i32_0 = arith.constant 0 : i32
    return %c0_i32, %arg0 : i32, i32
  }
  func.func @transform_2(%arg0: i32, %arg1: i32) -> (i32, i32) {
    %c0_i32 = arith.constant 0 : i32
    %c0_i32_0 = arith.constant 0 : i32
    return %c0_i32, %arg0 : i32, i32
  }
  func.func @transform_3(%arg0: i32, %arg1: i32) -> (i32, i32) {
    %c0_i32 = arith.constant 0 : i32
    %c0_i32_0 = arith.constant 0 : i32
    return %c0_i32, %arg0 : i32, i32
  }
  func.func @transform_4(%arg0: i32, %arg1: i32) -> (i32, i32) {
    %c0_i32 = arith.constant 0 : i32
    %c0_i32_0 = arith.constant 0 : i32
    return %c0_i32, %arg0 : i32, i32
  }
}

</mosaic_0001>

<bundles_post_ra>
// kernel: tpu_custom_call.1
= control target key start
LH: loop header
LB: loop body
LE: loop exit
PB: predicated region body
PF: predicated region fallthrough
CT: control target
= control target key end

     0   :  { %10 = vsyncpa [#allocation3], 0  ;;  %s253_s0 = inlined_call_operand.hbm [shape: f32[8,128], index: 0, kind: input, shape index: {}]   ;;  %s254_s1 = inlined_call_operand.vmem [shape: f32[1,128], index: 1, kind: input, shape index: {}]   ;;  %s255_s2 = inlined_call_operand.vmem [shape: f32[1,128], index: 2, kind: input, shape index: {}]   ;;  %s256_s3 = inlined_call_operand.hbm [shape: f32[1,128], index: 3, kind: output, shape index: {0}]   ;;  %s257_s4 = inlined_call_operand.hbm [shape: f32[1,128], index: 4, kind: output, shape index: {1}]  }
   0x1   :  { %11 = vsyncpa [#allocation4], 0 }
   0x2   :  { %12 = vsyncpa [#allocation7], 0  ;;  %s182_s15 = smov [#allocation2]   ;;  %s110_s19 = scalar_lea.hbm %s253_s0, 128 }
   0x3   :  { %s19_s16 = sshll.u32 %s182_s15, 4  ;;  %p111_p0 = scmp.ne.s32.totalorder %s253_s0, %s110_s19  ;;  %s20_s16 = int_to_ptr.vmem [resolvable:$true] %s19_s16 }
   0x4   :  { %p114_p1 = scmp.lt.u32.totalorder %s110_s19, %s253_s0 }
   0x6   :  { %p116_p2 = pnand %p114_p1, %p111_p0 }
   0x8   :  { %119 = shalt.err (!%p116_p2)
}
   0x9   :  { %s120_s24 = scalar_lea.vmem %s20_s16, 128  ;;  %p125_p4 = scmp.lt.s32.totalorder %s20_s16, %s20_s16 }
   0xa   :  { %p121_p3 = scmp.ne.s32.totalorder %s20_s16, %s120_s24  ;;  %p126_p5 = scmp.lt.s32.totalorder %s120_s24, %s120_s24 }
   0xc   :  { %p127_p6 = por %p126_p5, %p125_p4 }
   0xe   :  { %p128_p7 = pnand %p127_p6, %p121_p3 }
  0x10   :  { %131 = shalt.err (!%p128_p7)
}
  0x11   :  { %22 = dma.hbm_to_vmem [thread:$0]  %s253_s0, 128, %s20_s16, [#allocation3]  }
  0x12   :  { %176 = dma.done.wait [#allocation3], 128  }
  0x13   :  { %177 = vsyncadd [#allocation3], 4294967168  ;;  %v183_v0 = vmov 0.0   ;;  %v36_v1 = vld [vmem:[#allocation2] sm:$0xff]  ;;  %s184_s28 = smov [#allocation5]   ;;  %s185_s6 = smov [#allocation6]  }
  0x14   :  { %34 = vst [vmem:[#allocation5] sm:$0x1] %v183_v0  ;;  %35 = vst [vmem:[#allocation6] sm:$0x1] %v183_v0  ;;  %v38_v2 = vrot.slane %v36_v1, 4  ;;  %v47_v3 = vmul.f32 %v36_v1, %v36_v1  ;;  %s81_s29 = sshll.u32 %s184_s28, 4  ;;  %s82_s29 = int_to_ptr.vmem [resolvable:$true] %s81_s29 }
  0x15   :  { %v66_v27 = vld [vmem:[%s254_s1] sm:$0x1]  ;;  %s91_s7 = sshll.u32 %s185_s6, 4  ;;  %s132_s8 = scalar_lea.vmem %s82_s29, 16  ;;  %s92_s7 = int_to_ptr.vmem [resolvable:$true] %s91_s7 }
  0x16   :  { %v39_v4 = vadd.f32 %v38_v2, %v36_v1  ;;  %v48_v5 = vrot.slane %v47_v3, 4  ;;  %v71_v30 = vld [vmem:[%s255_s2] sm:$0x1]  ;;  %p133_p8 = scmp.ne.s32.totalorder %s82_s29, %s132_s8  ;;  %s136_s9 = scalar_lea.vmem %s82_s29, 32 }
  0x17   :  { %p137_p9 = scmp.lt.s32.totalorder %s82_s29, %s82_s29  ;;  %p138_p10 = scmp.lt.s32.totalorder %s136_s9, %s132_s8 }
  0x18   :  { %v40_v6 = vrot.slane %v39_v4, 2  ;;  %v49_v7 = vadd.f32 %v48_v5, %v47_v3 }
  0x19   :  { %p139_p11 = por %p138_p10, %p137_p9 }
  0x1a   :  { %v41_v8 = vadd.f32 %v40_v6, %v39_v4  ;;  %v50_v9 = vrot.slane %v49_v7, 2 }
  0x1b   :  { %v37_v12 = vld [vmem:[#allocation5] sm:$0x1]  ;;  %v46_v15 = vld [vmem:[#allocation6] sm:$0x1]  ;;  %p140_p12 = pnand %p139_p11, %p133_p8 }
  0x1c   :  { %v42_v10 = vrot.slane %v41_v8, 1  ;;  %v51_v11 = vadd.f32 %v50_v9, %v49_v7 }
  0x1e   :  { %v43_v13 = vadd.f32 %v42_v10, %v41_v8  ;;  %v52_v14 = vrot.slane %v51_v11, 1 }
  0x20   :  { %v44_v16 = vadd.f32 %v43_v13, %v37_v12  ;;  %v53_v17 = vadd.f32 %v52_v14, %v51_v11 }
  0x22   :  { %45 = vst [vmem:[#allocation5] sm:$0x1] %v44_v16  ;;  %v54_v18 = vadd.f32 %v53_v17, %v46_v15 }
  0x24   :  { %55 = vst [vmem:[#allocation6] sm:$0x1] %v54_v18 }
  0x29   :  { %v59_v19 = vld [vmem:[#allocation5] sm:$0x1] }
  0x2a   :  { %v60_v20 = vmul.f32 0.125, %v59_v19 }
  0x2b   :  { %v61_v21 = vld [vmem:[#allocation6] sm:$0x1] }
  0x2c   :  { %v62_v22 = vmul.f32 0.125, %v61_v21  ;;  %v63_v23 = vmul.f32 %v60_v20, %v60_v20 }
  0x2e   :  { %v64_v24 = vsub.f32 %v62_v22, %v63_v23 }
  0x30   :  { %v65_v25 = vmax.f32 %v64_v24, 0.0 }
  0x32   :  { %v67_v26 = vadd.f32 1e-05, %v65_v25 }
  0x34   :  { %108 = vrsqrt.f32 %v67_v26 }
  0x3e   :  { %v109_v28 = vpop.eup %108 }
  0x3f   :  { %v69_v29 = vmul.f32 %v109_v28, %v66_v27 }
  0x41   :  { %70 = vst [vmem:[#allocation5] sm:$0x1] %v69_v29  ;;  %v72_v31 = vmul.f32 %v69_v29, %v60_v20 }
  0x42   :  { %143 = shalt.err (!%p140_p12)
}
  0x43   :  { %s144_s11 = scalar_lea.hbm %s256_s3, 16 }
  0x44   :  { %p145_p13 = scmp.ne.s32.totalorder %s256_s3, %s144_s11  ;;  %p148_p0 = scmp.lt.u32.totalorder %s144_s11, %s256_s3 }
  0x46   :  { %p150_p1 = pnand %p148_p0, %p145_p13 }
  0x48   :  { %153 = shalt.err (!%p150_p1)
}
  0x49   :  { %84 = dma.vmem_to_hbm [thread:$0]  %s82_s29, 16, %s256_s3, [#allocation4]   ;;  %v73_v32 = vsub.f32 %v71_v30, %v72_v31 }
  0x4a   :  { %s154_s17 = scalar_lea.vmem %s92_s7, 16  ;;  %s158_s18 = scalar_lea.vmem %s92_s7, 32 }
  0x4b   :  { %74 = vst [vmem:[#allocation6] sm:$0x1] %v73_v32  ;;  %p155_p2 = scmp.ne.s32.totalorder %s92_s7, %s154_s17  ;;  %p159_p3 = scmp.lt.s32.totalorder %s92_s7, %s92_s7 }
  0x4c   :  { %p160_p4 = scmp.lt.s32.totalorder %s158_s18, %s154_s17 }
  0x4e   :  { %p161_p5 = por %p160_p4, %p159_p3 }
  0x50   :  { %p162_p6 = pnand %p161_p5, %p155_p2 }
  0x52   :  { %165 = shalt.err (!%p162_p6)
}
  0x53   :  { %s166_s21 = scalar_lea.hbm %s257_s4, 16 }
  0x54   :  { %p167_p7 = scmp.ne.s32.totalorder %s257_s4, %s166_s21  ;;  %p170_p8 = scmp.lt.u32.totalorder %s166_s21, %s257_s4 }
  0x56   :  { %p172_p9 = pnand %p170_p8, %p167_p7 }
  0x58   :  { %175 = shalt.err (!%p172_p9)
}
  0x59   :  { %94 = dma.vmem_to_hbm [thread:$0]  %s92_s7, 16, %s257_s4, [#allocation7]  }
  0x5a   :  { %178 = dma.done.wait [#allocation4], 16  }
  0x5b   :  { %179 = vsyncadd [#allocation4], 4294967280 }
  0x5c   :  { %180 = dma.done.wait [#allocation7], 16  }
  0x5d   :  { %181 = vsyncadd [#allocation7], 4294967280 }
  0x5e   :  { %101 = vsyncpa [#allocation3], 1 }
  0x5f   :  { %102 = vsyncpa [#allocation4], 1 }
  0x60   :  { %103 = vsyncpa [#allocation7], 1 }

</bundles_post_ra>
